<compile_context>
chip_gen: v7x
topology: tpu7x:2x2x1
jax: 0.10.0
libtpu: 0.0.40
codegen_flags: <defaults>
</compile_context>

<pallas_src>
import functools

import jax
import jax.numpy as jnp
from jax.experimental import pallas as pl
from jax.experimental.pallas import tpu as pltpu


def _round_up(x, m):
    return ((x + m - 1) // m) * m


def deepfc_kernel(x_ref, w1_ref, b1_ref, w2_ref, b2_ref, w3_ref, b3_ref,
                  w4_ref, b4_ref, o_ref):
    # Entire MLP hot path (4 matmuls + biases + 3 ReLUs) stays on-chip in VMEM / vregs.
    # Operands are bf16, accumulation and bias/ReLU epilogue are f32, next-matmul
    # operand is re-cast to bf16 (single cast per layer).
    x = x_ref[...]
    h = jnp.dot(x, w1_ref[...], preferred_element_type=jnp.float32) + b1_ref[...]
    h = jnp.maximum(h, 0.0).astype(jnp.bfloat16)
    h = jnp.dot(h, w2_ref[...], preferred_element_type=jnp.float32) + b2_ref[...]
    h = jnp.maximum(h, 0.0).astype(jnp.bfloat16)
    h = jnp.dot(h, w3_ref[...], preferred_element_type=jnp.float32) + b3_ref[...]
    h = jnp.maximum(h, 0.0).astype(jnp.bfloat16)
    y = jnp.dot(h, w4_ref[...], preferred_element_type=jnp.float32) + b4_ref[...]
    o_ref[...] = y.astype(o_ref.dtype)


@functools.partial(jax.jit, static_argnames=("block_b",))
def deepfc_forward(x, params, block_b=256):
    """x: [B, F] float32. params: dict of (w, b) per layer with w already [in, out]."""
    (w1, b1), (w2, b2), (w3, b3), (w4, b4) = (
        params["fc1"], params["fc2"], params["fc3"], params["out"])
    B, F = x.shape
    h1, h2, h3 = w1.shape[1], w2.shape[1], w3.shape[1]
    out_dim = w4.shape[1]

    # Batch tile: big enough to fill the MXU M dim, but never larger than the
    # (sublane-rounded) batch. Pad B to a whole number of tiles so every grid
    # step works on real rows (padding rows are zeros and sliced off at the end).
    bb = _round_up(min(block_b, _round_up(B, 8)), 8)
    B_pad = _round_up(B, bb)
    # Lane-dense output: pad output columns (and w4/b4) up to a multiple of 128.
    out_pad = _round_up(out_dim, 128)

    # bf16 operands (MXU-native), f32 biases.
    x_p = jnp.pad(x.astype(jnp.bfloat16), ((0, B_pad - B), (0, 0)))
    w1b = w1.astype(jnp.bfloat16)
    w2b = w2.astype(jnp.bfloat16)
    w3b = w3.astype(jnp.bfloat16)
    w4b = jnp.pad(w4.astype(jnp.bfloat16), ((0, 0), (0, out_pad - out_dim)))
    b4p = jnp.pad(b4, ((0, 0), (0, out_pad - out_dim)))

    grid = (B_pad // bb,)

    # Advisory cost estimate for XLA scheduling around the custom call.
    flops = 2 * B_pad * (F * h1 + h1 * h2 + h2 * h3 + h3 * out_pad)
    bytes_accessed = (
        x_p.size * 2
        + (w1b.size + w2b.size + w3b.size + w4b.size) * 2
        + (b1.size + b2.size + b3.size + b4p.size) * 4
        + B_pad * out_pad * 4)
    cost = pl.CostEstimate(flops=flops, transcendentals=0,
                           bytes_accessed=bytes_accessed)

    # Explicit VMEM budget (v7x only has 64 MiB total / 32 MiB default scoped):
    # double-buffered x/out tiles + (pipeline keeps 2 copies of) grid-invariant
    # weights/biases, plus headroom.
    weight_bytes = (w1b.size + w2b.size + w3b.size + w4b.size) * 2
    bias_bytes = (b1.size + b2.size + b3.size + b4p.size) * 4
    tile_bytes = bb * F * 2 + bb * out_pad * 4
    vmem_limit = int(min(max(2 * (weight_bytes + bias_bytes + tile_bytes) + (8 << 20),
                             16 << 20),
                         100 << 20))

    batch_map = lambda i: (i, 0)
    invariant_map = lambda i: (0, 0)
    weight_spec = lambda w: pl.BlockSpec(w.shape, invariant_map)

    out = pl.pallas_call(
        deepfc_kernel,
        out_shape=jax.ShapeDtypeStruct((B_pad, out_pad), jnp.float32),
        grid=grid,
        in_specs=[
            pl.BlockSpec((bb, F), batch_map),
            weight_spec(w1b), weight_spec(b1),
            weight_spec(w2b), weight_spec(b2),
            weight_spec(w3b), weight_spec(b3),
            weight_spec(w4b), weight_spec(b4p),
        ],
        out_specs=pl.BlockSpec((bb, out_pad), batch_map),
        compiler_params=pltpu.CompilerParams(
            dimension_semantics=("parallel",),
            vmem_limit_bytes=vmem_limit),
        cost_estimate=cost,
    )(x_p, w1b, b1, w2b, b2, w3b, b3, w4b, b4p)

    return out[:B, :out_dim].astype(x.dtype)


def init_deepfc_params(key, input_features, h_dims, output_dim, bias_std=1e-6):
    """Replicates init_params_Boris_David (weight std = sqrt(2/fan_in), normal)
    and init_params_normal for biases (std = bias_std). Returns weights as
    [in, out] (already transposed from PyTorch's [out, in] convention)."""
    dims_in = [input_features, h_dims[0], h_dims[1], h_dims[2]]
    dims_out = [h_dims[0], h_dims[1], h_dims[2], output_dim]
    names = ["fc1", "fc2", "fc3", "out"]
    params = {}
    for name, d_in, d_out in zip(names, dims_in, dims_out):
        key, kw, kb = jax.random.split(key, 3)
        std = jnp.sqrt(2.0 / float(d_in))  # fan_in of a Linear weight [out, in]
        w = std * jax.random.normal(kw, (d_in, d_out), dtype=jnp.float32)
        b = bias_std * jax.random.normal(kb, (1, d_out), dtype=jnp.float32)
        params[name] = (w, b)
    return params


def deepfc_reference_f32(x, params):
    (w1, b1), (w2, b2), (w3, b3), (w4, b4) = (
        params["fc1"], params["fc2"], params["fc3"], params["out"])
    h = jax.nn.relu(x @ w1 + b1)
    h = jax.nn.relu(h @ w2 + b2)
    h = jax.nn.relu(h @ w3 + b3)
    return h @ w4 + b4


def deepfc_reference_bf16(x, params):
    """Emulates the kernel's numerics (bf16 operands, f32 accumulate) in plain XLA."""
    bf = jnp.bfloat16
    (w1, b1), (w2, b2), (w3, b3), (w4, b4) = (
        params["fc1"], params["fc2"], params["fc3"], params["out"])
    h = jnp.dot(x.astype(bf), w1.astype(bf), preferred_element_type=jnp.float32) + b1
    h = jnp.maximum(h, 0.0).astype(bf)
    h = jnp.dot(h, w2.astype(bf), preferred_element_type=jnp.float32) + b2
    h = jnp.maximum(h, 0.0).astype(bf)
    h = jnp.dot(h, w3.astype(bf), preferred_element_type=jnp.float32) + b3
    h = jnp.maximum(h, 0.0).astype(bf)
    return jnp.dot(h, w4.astype(bf), preferred_element_type=jnp.float32) + b4


if __name__ == "__main__":
    key = jax.random.PRNGKey(0)
    key, kx, kp = jax.random.split(key, 3)

    # Small, forward-consistent shapes. batch=200 with block_b=128 exercises
    # both the multi-step parallel grid (2 steps -> both v7x TensorCores) and
    # the batch-padding path.
    batch = 200
    input_features = 32
    h_dims = (64, 64, 64)
    output_dim = 16

    x = jax.random.normal(kx, (batch, input_features), dtype=jnp.float32)
    params = init_deepfc_params(kp, input_features, h_dims, output_dim)

    out = deepfc_forward(x, params, block_b=128)
    out = jax.block_until_ready(out)
    assert out.shape == (batch, output_dim)

    # Tight check against a reference with identical bf16-operand / f32-accumulate numerics.
    ref_bf16 = deepfc_reference_bf16(x, params)
    assert jnp.allclose(out, ref_bf16, atol=1e-2, rtol=1e-2)

    # Looser check against the pure-f32 PyTorch-equivalent forward (bf16 operand rounding).
    ref_f32 = deepfc_reference_f32(x, params)
    assert jnp.allclose(out, ref_f32, atol=5e-2, rtol=5e-2)

    print("KERNEL_OK")
</pallas_src>

<mosaic_0001>
module attributes {stable_mosaic.version = 11 : i64} {
  func.func @deepfc_kernel(%arg0: i32, %arg1: memref<128x32xbf16, #tpu.memory_space<vmem>>, %arg2: memref<32x64xbf16, #tpu.memory_space<vmem>>, %arg3: memref<1x64xf32, #tpu.memory_space<vmem>>, %arg4: memref<64x64xbf16, #tpu.memory_space<vmem>>, %arg5: memref<1x64xf32, #tpu.memory_space<vmem>>, %arg6: memref<64x64xbf16, #tpu.memory_space<vmem>>, %arg7: memref<1x64xf32, #tpu.memory_space<vmem>>, %arg8: memref<64x128xbf16, #tpu.memory_space<vmem>>, %arg9: memref<1x128xf32, #tpu.memory_space<vmem>>, %arg10: memref<128x128xf32, #tpu.memory_space<vmem>>) attributes {dimension_semantics = [#tpu.dimension_semantics<parallel>], iteration_bounds = array<i64: 2>, scalar_prefetch = 0 : i64, scratch_operands = 0 : i64, tpu.core_type = #tpu.core_type<tc>, window_params = [{transform_indices = @transform_0, window_bounds = array<i64: 128, 32>}, {pipeline_mode = #tpu.pipeline_mode<synchronous>, transform_indices = @transform_1, window_bounds = array<i64: 32, 64>}, {pipeline_mode = #tpu.pipeline_mode<synchronous>, transform_indices = @transform_2, window_bounds = array<i64: 1, 64>}, {pipeline_mode = #tpu.pipeline_mode<synchronous>, transform_indices = @transform_3, window_bounds = array<i64: 64, 64>}, {pipeline_mode = #tpu.pipeline_mode<synchronous>, transform_indices = @transform_4, window_bounds = array<i64: 1, 64>}, {pipeline_mode = #tpu.pipeline_mode<synchronous>, transform_indices = @transform_5, window_bounds = array<i64: 64, 64>}, {pipeline_mode = #tpu.pipeline_mode<synchronous>, transform_indices = @transform_6, window_bounds = array<i64: 1, 64>}, {pipeline_mode = #tpu.pipeline_mode<synchronous>, transform_indices = @transform_7, window_bounds = array<i64: 64, 128>}, {pipeline_mode = #tpu.pipeline_mode<synchronous>, transform_indices = @transform_8, window_bounds = array<i64: 1, 128>}, {transform_indices = @transform_9, window_bounds = array<i64: 128, 128>}]} {
    %c0 = arith.constant 0 : index
    %c0_0 = arith.constant 0 : index
    %0 = vector.load %arg1[%c0, %c0_0] : memref<128x32xbf16, #tpu.memory_space<vmem>>, vector<128x32xbf16>
    %c0_1 = arith.constant 0 : index
    %c0_2 = arith.constant 0 : index
    %1 = vector.load %arg2[%c0_1, %c0_2] : memref<32x64xbf16, #tpu.memory_space<vmem>>, vector<32x64xbf16>
    %cst = arith.constant dense<0.000000e+00> : vector<128x64xf32>
    %2 = tpu.matmul %0, %1, %cst {dimension_numbers = #tpu.dot_dimension_numbers<[1], [0], [0], [1], [0, 0, 1, 1], [], []>} : vector<128x32xbf16>, vector<32x64xbf16>, vector<128x64xf32> -> vector<128x64xf32>
    %c0_3 = arith.constant 0 : index
    %c0_4 = arith.constant 0 : index
    %3 = vector.load %arg3[%c0_3, %c0_4] : memref<1x64xf32, #tpu.memory_space<vmem>>, vector<1x64xf32>
    %4 = vector.broadcast %3 : vector<1x64xf32> to vector<128x64xf32>
    %5 = arith.addf %2, %4 : vector<128x64xf32>
    %cst_5 = arith.constant 0.000000e+00 : f32
    %6 = vector.broadcast %cst_5 : f32 to vector<128x64xf32>
    %7 = arith.maximumf %5, %6 : vector<128x64xf32>
    %8 = arith.truncf %7 : vector<128x64xf32> to vector<128x64xbf16>
    %c0_6 = arith.constant 0 : index
    %c0_7 = arith.constant 0 : index
    %9 = vector.load %arg4[%c0_6, %c0_7] : memref<64x64xbf16, #tpu.memory_space<vmem>>, vector<64x64xbf16>
    %cst_8 = arith.constant dense<0.000000e+00> : vector<128x64xf32>
    %10 = tpu.matmul %8, %9, %cst_8 {dimension_numbers = #tpu.dot_dimension_numbers<[1], [0], [0], [1], [0, 0, 1, 1], [], []>} : vector<128x64xbf16>, vector<64x64xbf16>, vector<128x64xf32> -> vector<128x64xf32>
    %c0_9 = arith.constant 0 : index
    %c0_10 = arith.constant 0 : index
    %11 = vector.load %arg5[%c0_9, %c0_10] : memref<1x64xf32, #tpu.memory_space<vmem>>, vector<1x64xf32>
    %12 = vector.broadcast %11 : vector<1x64xf32> to vector<128x64xf32>
    %13 = arith.addf %10, %12 : vector<128x64xf32>
    %cst_11 = arith.constant 0.000000e+00 : f32
    %14 = vector.broadcast %cst_11 : f32 to vector<128x64xf32>
    %15 = arith.maximumf %13, %14 : vector<128x64xf32>
    %16 = arith.truncf %15 : vector<128x64xf32> to vector<128x64xbf16>
    %c0_12 = arith.constant 0 : index
    %c0_13 = arith.constant 0 : index
    %17 = vector.load %arg6[%c0_12, %c0_13] : memref<64x64xbf16, #tpu.memory_space<vmem>>, vector<64x64xbf16>
    %cst_14 = arith.constant dense<0.000000e+00> : vector<128x64xf32>
    %18 = tpu.matmul %16, %17, %cst_14 {dimension_numbers = #tpu.dot_dimension_numbers<[1], [0], [0], [1], [0, 0, 1, 1], [], []>} : vector<128x64xbf16>, vector<64x64xbf16>, vector<128x64xf32> -> vector<128x64xf32>
    %c0_15 = arith.constant 0 : index
    %c0_16 = arith.constant 0 : index
    %19 = vector.load %arg7[%c0_15, %c0_16] : memref<1x64xf32, #tpu.memory_space<vmem>>, vector<1x64xf32>
    %20 = vector.broadcast %19 : vector<1x64xf32> to vector<128x64xf32>
    %21 = arith.addf %18, %20 : vector<128x64xf32>
    %cst_17 = arith.constant 0.000000e+00 : f32
    %22 = vector.broadcast %cst_17 : f32 to vector<128x64xf32>
    %23 = arith.maximumf %21, %22 : vector<128x64xf32>
    %24 = arith.truncf %23 : vector<128x64xf32> to vector<128x64xbf16>
    %c0_18 = arith.constant 0 : index
    %c0_19 = arith.constant 0 : index
    %25 = vector.load %arg8[%c0_18, %c0_19] : memref<64x128xbf16, #tpu.memory_space<vmem>>, vector<64x128xbf16>
    %cst_20 = arith.constant dense<0.000000e+00> : vector<128x128xf32>
    %26 = tpu.matmul %24, %25, %cst_20 {dimension_numbers = #tpu.dot_dimension_numbers<[1], [0], [0], [1], [0, 0, 1, 1], [], []>} : vector<128x64xbf16>, vector<64x128xbf16>, vector<128x128xf32> -> vector<128x128xf32>
    %c0_21 = arith.constant 0 : index
    %c0_22 = arith.constant 0 : index
    %27 = vector.load %arg9[%c0_21, %c0_22] : memref<1x128xf32, #tpu.memory_space<vmem>>, vector<1x128xf32>
    %28 = vector.broadcast %27 : vector<1x128xf32> to vector<128x128xf32>
    %29 = arith.addf %26, %28 : vector<128x128xf32>
    %c0_23 = arith.constant 0 : index
    %c0_24 = arith.constant 0 : index
    %30 = vector.load %arg10[%c0_23, %c0_24] : memref<128x128xf32, #tpu.memory_space<vmem>>, vector<128x128xf32>
    tpu.vector_store %arg10[%c0_23, %c0_24], %29 {strides = array<i32>} : memref<128x128xf32, #tpu.memory_space<vmem>>, vector<128x128xf32>,
    return
  }
  func.func @transform_0(%arg0: i32) -> (i32, i32) {
    %c0_i32 = arith.constant 0 : i32
    %c0_i32_0 = arith.constant 0 : i32
    return %arg0, %c0_i32 : i32, i32
  }
  func.func @transform_1(%arg0: i32) -> (i32, i32) {
    %c0_i32 = arith.constant 0 : i32
    %c0_i32_0 = arith.constant 0 : i32
    %c0_i32_1 = arith.constant 0 : i32
    return %c0_i32, %c0_i32_0 : i32, i32
  }
  func.func @transform_2(%arg0: i32) -> (i32, i32) {
    %c0_i32 = arith.constant 0 : i32
    %c0_i32_0 = arith.constant 0 : i32
    %c0_i32_1 = arith.constant 0 : i32
    return %c0_i32, %c0_i32_0 : i32, i32
  }
  func.func @transform_3(%arg0: i32) -> (i32, i32) {
    %c0_i32 = arith.constant 0 : i32
    %c0_i32_0 = arith.constant 0 : i32
    %c0_i32_1 = arith.constant 0 : i32
    return %c0_i32, %c0_i32_0 : i32, i32
  }
  func.func @transform_4(%arg0: i32) -> (i32, i32) {
    %c0_i32 = arith.constant 0 : i32
    %c0_i32_0 = arith.constant 0 : i32
    %c0_i32_1 = arith.constant 0 : i32
    return %c0_i32, %c0_i32_0 : i32, i32
  }
  func.func @transform_5(%arg0: i32) -> (i32, i32) {
    %c0_i32 = arith.constant 0 : i32
    %c0_i32_0 = arith.constant 0 : i32
    %c0_i32_1 = arith.constant 0 : i32
    return %c0_i32, %c0_i32_0 : i32, i32
  }
  func.func @transform_6(%arg0: i32) -> (i32, i32) {
    %c0_i32 = arith.constant 0 : i32
    %c0_i32_0 = arith.constant 0 : i32
    %c0_i32_1 = arith.constant 0 : i32
    return %c0_i32, %c0_i32_0 : i32, i32
  }
  func.func @transform_7(%arg0: i32) -> (i32, i32) {
    %c0_i32 = arith.constant 0 : i32
    %c0_i32_0 = arith.constant 0 : i32
    %c0_i32_1 = arith.constant 0 : i32
    return %c0_i32, %c0_i32_0 : i32, i32
  }
  func.func @transform_8(%arg0: i32) -> (i32, i32) {
    %c0_i32 = arith.constant 0 : i32
    %c0_i32_0 = arith.constant 0 : i32
    %c0_i32_1 = arith.constant 0 : i32
    return %c0_i32, %c0_i32_0 : i32, i32
  }
  func.func @transform_9(%arg0: i32) -> (i32, i32) {
    %c0_i32 = arith.constant 0 : i32
    %c0_i32_0 = arith.constant 0 : i32
    return %arg0, %c0_i32 : i32, i32
  }
}

</mosaic_0001>

<bundles_post_ra>
// kernel: deepfc_forward.1
= control target key start
LH: loop header
LB: loop body
LE: loop exit
PB: predicated region body
PF: predicated region fallthrough
CT: control target
= control target key end

     0   :  { %s1458_s30 = smov 0   ;;  %s1583_s0 = inlined_call_operand.vmem [shape: bf16[256,32], index: 0, kind: input, shape index: {}]   ;;  %s1584_s1 = inlined_call_operand.vmem [shape: bf16[32,64], index: 1, kind: input, shape index: {}]   ;;  %s1585_s2 = inlined_call_operand.vmem [shape: f32[1,64], index: 2, kind: input, shape index: {}]   ;;  %s1586_s3 = inlined_call_operand.vmem [shape: bf16[64,64], index: 3, kind: input, shape index: {}]   ;;  %s1587_s4 = inlined_call_operand.vmem [shape: f32[1,64], index: 4, kind: input, shape index: {}]   ;;  %s1588_s5 = inlined_call_operand.vmem [shape: bf16[64,64], index: 5, kind: input, shape index: {}]   ;;  %s1589_s6 = inlined_call_operand.vmem [shape: f32[1,64], index: 6, kind: input, shape index: {}]   ;;  %s1590_s7 = inlined_call_operand.vmem [shape: bf16[64,128], index: 7, kind: input, shape index: {}]   ;;  %s1591_s8 = inlined_call_operand.vmem [shape: f32[1,128], index: 8, kind: input, shape index: {}]   ;;  %s1592_s9 = inlined_call_operand.vmem [shape: f32[256,128], index: 9, kind: output, shape index: {}]  }
   0x1 LB: > { %s1163_s10 = sadd.s32 4294967295, %s1406_s30   ;;  %p1167_p0 = scmp.ge.s32.totalorder %s1406_s30, 1  ;;  %s1406_s30 = sphi %s1458_s30, %s19_s30  }
   0x2   : > { %p288_p1 = scmp.lt.s32.totalorder %s1406_s30, 3 }
   0x4   : > { %p289_p2 = pnand %p1167_p0, %p288_p1 }
   0x5   : > { %v1378_v0 = vld [vmem:[%s1584_s1] sm:$0xff] (!%p289_p2)   ;;  %s1168_s13 = sshll.u32 (!%p289_p2), %s1163_s10, 4  ;;  %v1379_v1 = vld [vmem:[%s1584_s1 + $0x8] sm:$0xff] (!%p289_p2)   ;;  %vm416_vm0 = vcmask (!%p289_p2), 261120   ;;  %v1390_v12 = vld [vmem:[%s1586_s3 + $0x10] sm:$0xff] (!%p289_p2)   ;;  %vm601_vm1 = vcmask (!%p289_p2), 523264  }
   0x6   : > { %292 = sbr.rel (%p289_p2) target bundleno = 926 (0x39e), region = 56  ;;  %p325_p3 = scmp.lt.s32.totalorder (!%p289_p2), %s1168_s13, 31  ;;  %1278 = vmatprep.subr.bf16.mxu0 (!%p289_p2), %v1378_v0  ;;  %v1388_v2 = vld [vmem:[%s1586_s3] sm:$0xff] (!%p289_p2)   ;;  %v1389_v3 = vld [vmem:[%s1586_s3 + $0x8] sm:$0xff] (!%p289_p2)   ;;  %v1391_v13 = vld [vmem:[%s1586_s3 + $0x18] sm:$0xff] (!%p289_p2)  }
   0x7   : > { %1279 = vmatpush3.bf16.msra.mxu0 (!%p289_p2), %v1378_v0  ;;  %1298 = vmatprep.subr.bf16.mxu1 (!%p289_p2), %v1388_v2  ;;  %v1392_v14 = vld [vmem:[%s1588_s5] sm:$0xff] (!%p289_p2)   ;;  %v1393_v15 = vld [vmem:[%s1588_s5 + $0x8] sm:$0xff] (!%p289_p2)   ;;  %v1394_v16 = vld [vmem:[%s1588_s5 + $0x10] sm:$0xff] (!%p289_p2)  }
   0x8   : > { %1280 = vmatprep.subr.bf16.mxu0 (!%p289_p2), %v1379_v1  ;;  %1299 = vmatpush3.bf16.msra.mxu1 (!%p289_p2), %v1388_v2  ;;  %v1172_v17 = vld [vmem:[%s1585_s2] ss:$0 sm:$0xff] (!%p289_p2) }
   0x9   : > { %1300 = vmatprep.subr.bf16.mxu1 (!%p289_p2), %v1389_v3 }
   0xb   : > { %1281 = vmatpush3.bf16.msra.mxu0 (!%p289_p2), %v1379_v1 }
   0xc   : > { %1301 = vmatpush3.bf16.msra.mxu1 (!%p289_p2), %v1389_v3  ;;  %1322 = vmatprep.subr.bf16.mxu0 (!%p289_p2), %v1392_v14 }
   0xd   : > { %s1594_s13 = smov (!%p325_p3, %s1168_s13), 31  ;;  %1302 = vmatprep.subr.bf16.mxu1 %v1390_v12 }
   0xe   : > { %s1169_s20 = sshll.u32 %s1594_s13, 2  ;;  %s1171_s11 = sshll.u32 %s1594_s13, 3 }
   0xf   : > { %s328_s23 = scalar_lea.vmem %s1583_s0, %s1169_s20  ;;  %s1562_s17 = scalar_lea.vmem %s1592_s9, %s1171_s11 }
  0x10   : > { %v1380_v4 = vld [vmem:[%s328_s23] sm:$0xff]   ;;  %v1381_v5 = vld [vmem:[%s328_s23 + $0x8] sm:$0xff]   ;;  %v1382_v6 = vld [vmem:[%s328_s23 + $0x10] sm:$0xff]   ;;  %1303 = vmatpush3.bf16.msra.mxu1 %v1390_v12 }
  0x11   : > { %1282 = vmatprep.mubr.msk.bf16.mxu0 %vm416_vm0, %v1380_v4  ;;  %v1383_v7 = vld [vmem:[%s328_s23 + $0x18] sm:$0xff]   ;;  %v1384_v8 = vld [vmem:[%s328_s23 + $0x20] sm:$0xff]   ;;  %v1385_v9 = vld [vmem:[%s328_s23 + $0x28] sm:$0xff]   ;;  %1304 = vmatprep.subr.bf16.mxu1 %v1391_v13 }
  0x12   : > { %1283 = vmatmul.mubr.msk.bf16.vlgmr.msra.gmra.mrb[0].mxu0 %vm416_vm0, %v1381_v5  ;;  %v1386_v10 = vld [vmem:[%s328_s23 + $0x30] sm:$0xff]   ;;  %v1387_v11 = vld [vmem:[%s328_s23 + $0x38] sm:$0xff]   ;;  %v1397_v12 = vld [vmem:[%s1590_s7 + $0x8] sm:$0xff]  }
  0x13   : > { %1286 = vmatprep.mubr.msk.bf16.mxu0 %vm416_vm0, %v1382_v6  ;;  %1323 = vmatpush3.bf16.msra.mxu0 %v1392_v14  ;;  %v1191_v14 = vld [vmem:[%s1587_s4] ss:$0 sm:$0xff] }
  0x14   : > { %1305 = vmatpush3.bf16.msra.mxu1 %v1391_v13  ;;  %1324 = vmatprep.subr.bf16.mxu0 %v1393_v15  ;;  %v1398_v13 = vld [vmem:[%s1590_s7 + $0x10] sm:$0xff]  }
  0x17   : > { %1325 = vmatpush3.bf16.msra.mxu0 %v1393_v15 }
  0x18   : > { %1326 = vmatprep.subr.bf16.mxu0 %v1394_v16 }
  0x1a   : > { %1287 = vmatmul.mubr.msk.bf16.gmra.mrb[4].mxu0 %vm416_vm0, %v1383_v7 }
  0x1b   : > { %1290 = vmatprep.mubr.msk.bf16.mxu0 %vm416_vm0, %v1384_v8  ;;  %1327 = vmatpush3.bf16.msra.mxu0 %v1394_v16 }
  0x22   : > { %1291 = vmatmul.mubr.msk.bf16.gmra.mrb[8].mxu0 %vm416_vm0, %v1385_v9 }
  0x23   : > { %1294 = vmatprep.mubr.msk.bf16.mxu0 %vm416_vm0, %v1386_v10  ;;  %v1395_v10 = vld [vmem:[%s1588_s5 + $0x18] sm:$0xff]  }
  0x24   : > { %1328 = vmatprep.subr.bf16.mxu0 %v1395_v10 }
  0x25   : > { %1329 = vmatpush3.bf16.msra.mxu0 %v1395_v10 }
  0x2a   : > { %1295 = vmatmul.mubr.msk.bf16.gmra.mrb[12].mxu0 %vm416_vm0, %v1387_v11  ;;  %v1396_v11 = vld [vmem:[%s1590_s7] sm:$0xff]  }
  0x2b   : > { %1346 = vmatprep.subr.bf16.mxu1 %v1396_v11 }
  0xe5   : > { %v1284_v18 = vpop.f32.mrb[0].mxu0 }
  0xe6   : > { %v484_v19 = vadd.f32 %v1284_v18, %v1172_v17  ;;  %v475_v20 = vpop.f32.mrb[1].mxu0 }
  0xe7   : > { %v476_v21 = vadd.f32 %v1172_v17, %v475_v20  ;;  %v1285_v22 = vpop.f32.mrb[2].mxu0 }
  0xe8   : > { %v487_v23 = vadd.f32 %v1285_v22, %v1172_v17  ;;  %v478_v24 = vpop.f32.mrb[3].mxu0  ;;  %v540_v26 = vmax.f32 %v484_v19, 0.0 }
  0xe9   : > { %v479_v25 = vadd.f32 %v1172_v17, %v478_v24  ;;  %v538_v28 = vmax.f32 %v476_v21, 0.0 }
  0xea   : > { %v541_v27 = vmax.f32 %v487_v23, 0.0 }
  0xeb   : > { %v539_v29 = vmax.f32 %v479_v25, 0.0 }
  0xec   : > { %v555_v30 = vpack.c.bf16 %v541_v27, %v540_v26 }
  0xed   : > { %v1288_v31 = vpop.f32.mrb[4].mxu0  ;;  %v554_v32 = vpack.c.bf16 %v539_v29, %v538_v28 }
  0xee   : > { %v500_v33 = vadd.f32 %v1288_v31, %v1172_v17  ;;  %v491_v34 = vpop.f32.mrb[5].mxu0 }
  0xef   : > { %v492_v35 = vadd.f32 %v1172_v17, %v491_v34  ;;  %v1289_v36 = vpop.f32.mrb[6].mxu0  ;;  %1306 = vmatprep.mubr.msk.bf16.mxu1 %vm601_vm1, %v554_v32 }
  0xf0   : > { %v503_v37 = vadd.f32 %v1289_v36, %v1172_v17  ;;  %v494_v38 = vpop.f32.mrb[7].mxu0  ;;  %1307 = vmatmul.mubr.msk.bf16.vlgmr.msra.gmra.mrb[0].mxu1 %vm601_vm1, %v555_v30  ;;  %v544_v40 = vmax.f32 %v500_v33, 0.0 }
  0xf1   : > { %v495_v39 = vadd.f32 %v1172_v17, %v494_v38  ;;  %v542_v42 = vmax.f32 %v492_v35, 0.0  ;;  %1347 = vmatpush3.bf16.msra.mxu1 %v1396_v11 }
  0xf2   : > { %v545_v41 = vmax.f32 %v503_v37, 0.0  ;;  %1348 = vmatprep.subr.bf16.mxu1 %v1397_v12 }
  0xf3   : > { %v543_v43 = vmax.f32 %v495_v39, 0.0 }
  0xf4   : > { %v557_v44 = vpack.c.bf16 %v545_v41, %v544_v40 }
  0xf5   : > { %v556_v45 = vpack.c.bf16 %v543_v43, %v542_v42  ;;  %v1292_v46 = vpop.f32.mrb[8].mxu0  ;;  %1349 = vmatpush3.bf16.msra.mxu1 %v1397_v12 }
  0xf6   : > { %v516_v47 = vadd.f32 %v1292_v46, %v1172_v17  ;;  %v507_v48 = vpop.f32.mrb[9].mxu0  ;;  %1350 = vmatprep.subr.bf16.mxu1 %v1398_v13 }
  0xf7   : > { %v508_v49 = vadd.f32 %v1172_v17, %v507_v48  ;;  %v1293_v50 = vpop.f32.mrb[10].mxu0  ;;  %1310 = vmatprep.mubr.msk.bf16.mxu1 %vm601_vm1, %v556_v45 }
  0xf8   : > { %v519_v51 = vadd.f32 %v1293_v50, %v1172_v17  ;;  %v510_v52 = vpop.f32.mrb[11].mxu0  ;;  %1311 = vmatmul.mubr.msk.bf16.gmra.mrb[4].mxu1 %vm601_vm1, %v557_v44  ;;  %v548_v54 = vmax.f32 %v516_v47, 0.0 }
  0xf9   : > { %v511_v53 = vadd.f32 %v1172_v17, %v510_v52  ;;  %v546_v56 = vmax.f32 %v508_v49, 0.0  ;;  %1351 = vmatpush3.bf16.msra.mxu1 %v1398_v13 }
  0xfa   : > { %v549_v55 = vmax.f32 %v519_v51, 0.0 }
  0xfb   : > { %v547_v57 = vmax.f32 %v511_v53, 0.0 }
  0xfc   : > { %v559_v58 = vpack.c.bf16 %v549_v55, %v548_v54 }
  0xfd   : > { %v558_v59 = vpack.c.bf16 %v547_v57, %v546_v56  ;;  %v1296_v60 = vpop.f32.mrb[12].mxu0 }
  0xfe   : > { %v532_v61 = vadd.f32 %v1296_v60, %v1172_v17  ;;  %v523_v62 = vpop.f32.mrb[13].mxu0 }
  0xff   : > { %v524_v63 = vadd.f32 %v1172_v17, %v523_v62  ;;  %v1297_v0 = vpop.f32.mrb[14].mxu0  ;;  %1314 = vmatprep.mubr.msk.bf16.mxu1 %vm601_vm1, %v558_v59 }
 0x100   : > { %v535_v1 = vadd.f32 %v1297_v0, %v1172_v17  ;;  %v526_v2 = vpop.f32.mrb[15].mxu0  ;;  %1315 = vmatmul.mubr.msk.bf16.gmra.mrb[8].mxu1 %vm601_vm1, %v559_v58  ;;  %v552_v4 = vmax.f32 %v532_v61, 0.0 }
 0x101   : > { %v527_v3 = vadd.f32 %v1172_v17, %v526_v2  ;;  %v550_v6 = vmax.f32 %v524_v63, 0.0 }
 0x102   : > { %v553_v5 = vmax.f32 %v535_v1, 0.0 }
 0x103   : > { %v551_v7 = vmax.f32 %v527_v3, 0.0 }
 0x104   : > { %v561_v8 = vpack.c.bf16 %v553_v5, %v552_v4 }
 0x105   : > { %v560_v9 = vpack.c.bf16 %v551_v7, %v550_v6  ;;  %v1399_v7 = vld [vmem:[%s1590_s7 + $0x18] sm:$0xff]  }
 0x106   : > { %1352 = vmatprep.subr.bf16.mxu1 %v1399_v7 }
 0x107   : > { %1318 = vmatprep.mubr.msk.bf16.mxu1 %vm601_vm1, %v560_v9  ;;  %1353 = vmatpush3.bf16.msra.mxu1 %v1399_v7 }
 0x108   : > { %1319 = vmatmul.mubr.msk.bf16.gmra.mrb[12].mxu1 %vm601_vm1, %v561_v8  ;;  %v1204_v8 = vld [vmem:[%s1589_s6] ss:$0 sm:$0xff] }
 0x1c3   : > { %v1308_v15 = vpop.f32.mrb[0].mxu1 }
 0x1c4   : > { %v669_v16 = vadd.f32 %v1308_v15, %v1191_v14  ;;  %v660_v17 = vpop.f32.mrb[1].mxu1 }
 0x1c5   : > { %v661_v18 = vadd.f32 %v1191_v14, %v660_v17  ;;  %v1309_v19 = vpop.f32.mrb[2].mxu1 }
 0x1c6   : > { %v672_v20 = vadd.f32 %v1309_v19, %v1191_v14  ;;  %v663_v21 = vpop.f32.mrb[3].mxu1  ;;  %v725_v23 = vmax.f32 %v669_v16, 0.0 }
 0x1c7   : > { %v664_v22 = vadd.f32 %v1191_v14, %v663_v21  ;;  %v723_v25 = vmax.f32 %v661_v18, 0.0 }
 0x1c8   : > { %v726_v24 = vmax.f32 %v672_v20, 0.0 }
 0x1c9   : > { %v724_v26 = vmax.f32 %v664_v22, 0.0 }
 0x1ca   : > { %v740_v27 = vpack.c.bf16 %v726_v24, %v725_v23 }
 0x1cb   : > { %v739_v28 = vpack.c.bf16 %v724_v26, %v723_v25  ;;  %v1312_v29 = vpop.f32.mrb[4].mxu1 }
 0x1cc   : > { %v685_v30 = vadd.f32 %v1312_v29, %v1191_v14  ;;  %v676_v31 = vpop.f32.mrb[5].mxu1 }
 0x1cd   : > { %v677_v32 = vadd.f32 %v1191_v14, %v676_v31  ;;  %v1313_v33 = vpop.f32.mrb[6].mxu1  ;;  %1330 = vmatprep.mubr.msk.bf16.mxu0 %vm601_vm1, %v739_v28 }
 0x1ce   : > { %v688_v34 = vadd.f32 %v1313_v33, %v1191_v14  ;;  %v679_v35 = vpop.f32.mrb[7].mxu1  ;;  %1331 = vmatmul.mubr.msk.bf16.vlgmr.msra.gmra.mrb[16].mxu0 %vm601_vm1, %v740_v27  ;;  %v729_v37 = vmax.f32 %v685_v30, 0.0 }
 0x1cf   : > { %v680_v36 = vadd.f32 %v1191_v14, %v679_v35  ;;  %v727_v39 = vmax.f32 %v677_v32, 0.0 }
 0x1d0   : > { %v730_v38 = vmax.f32 %v688_v34, 0.0 }
 0x1d1   : > { %v728_v40 = vmax.f32 %v680_v36, 0.0 }
 0x1d2   : > { %v742_v41 = vpack.c.bf16 %v730_v38, %v729_v37 }
 0x1d3   : > { %v741_v42 = vpack.c.bf16 %v728_v40, %v727_v39  ;;  %v1316_v43 = vpop.f32.mrb[8].mxu1 }
 0x1d4   : > { %v701_v44 = vadd.f32 %v1316_v43, %v1191_v14  ;;  %v692_v45 = vpop.f32.mrb[9].mxu1 }
 0x1d5   : > { %v693_v46 = vadd.f32 %v1191_v14, %v692_v45  ;;  %v1317_v47 = vpop.f32.mrb[10].mxu1  ;;  %1334 = vmatprep.mubr.msk.bf16.mxu0 %vm601_vm1, %v741_v42 }
 0x1d6   : > { %v704_v48 = vadd.f32 %v1317_v47, %v1191_v14  ;;  %v695_v49 = vpop.f32.mrb[11].mxu1  ;;  %1335 = vmatmul.mubr.msk.bf16.gmra.mrb[20].mxu0 %vm601_vm1, %v742_v41  ;;  %v733_v51 = vmax.f32 %v701_v44, 0.0 }
 0x1d7   : > { %v696_v50 = vadd.f32 %v1191_v14, %v695_v49  ;;  %v731_v53 = vmax.f32 %v693_v46, 0.0 }
 0x1d8   : > { %v734_v52 = vmax.f32 %v704_v48, 0.0 }
 0x1d9   : > { %v732_v54 = vmax.f32 %v696_v50, 0.0 }
 0x1da   : > { %v744_v55 = vpack.c.bf16 %v734_v52, %v733_v51 }
 0x1db   : > { %v743_v56 = vpack.c.bf16 %v732_v54, %v731_v53  ;;  %v1320_v57 = vpop.f32.mrb[12].mxu1 }
 0x1dc   : > { %v717_v58 = vadd.f32 %v1320_v57, %v1191_v14  ;;  %v708_v59 = vpop.f32.mrb[13].mxu1 }
 0x1dd   : > { %v709_v60 = vadd.f32 %v1191_v14, %v708_v59  ;;  %v1321_v61 = vpop.f32.mrb[14].mxu1  ;;  %1338 = vmatprep.mubr.msk.bf16.mxu0 %vm601_vm1, %v743_v56 }
 0x1de   : > { %v720_v62 = vadd.f32 %v1321_v61, %v1191_v14  ;;  %v711_v63 = vpop.f32.mrb[15].mxu1  ;;  %1339 = vmatmul.mubr.msk.bf16.gmra.mrb[24].mxu0 %vm601_vm1, %v744_v55  ;;  %v737_v1 = vmax.f32 %v717_v58, 0.0 }
 0x1df   : > { %v712_v0 = vadd.f32 %v1191_v14, %v711_v63  ;;  %v735_v3 = vmax.f32 %v709_v60, 0.0 }
 0x1e0   : > { %v738_v2 = vmax.f32 %v720_v62, 0.0 }
 0x1e1   : > { %v736_v4 = vmax.f32 %v712_v0, 0.0 }
 0x1e2   : > { %v746_v5 = vpack.c.bf16 %v738_v2, %v737_v1  ;;  %v1217_v1 = vld [vmem:[%s1591_s8] ss:$0 sm:$0xff] }
 0x1e3   : > { %v745_v6 = vpack.c.bf16 %v736_v4, %v735_v3 }
 0x1e5   : > { %1342 = vmatprep.mubr.msk.bf16.mxu0 %vm601_vm1, %v745_v6 }
 0x1e6   : > { %1343 = vmatmul.mubr.msk.bf16.gmra.mrb[28].mxu0 %vm601_vm1, %v746_v5 }
 0x2a1   : > { %v1332_v9 = vpop.f32.mrb[16].mxu0 }
 0x2a2   : > { %v853_v10 = vadd.f32 %v1332_v9, %v1204_v8  ;;  %v844_v11 = vpop.f32.mrb[17].mxu0 }
 0x2a3   : > { %v845_v12 = vadd.f32 %v1204_v8, %v844_v11  ;;  %v1333_v13 = vpop.f32.mrb[18].mxu0 }
 0x2a4   : > { %v856_v14 = vadd.f32 %v1333_v13, %v1204_v8  ;;  %v847_v15 = vpop.f32.mrb[19].mxu0  ;;  %v909_v17 = vmax.f32 %v853_v10, 0.0 }
 0x2a5   : > { %v848_v16 = vadd.f32 %v1204_v8, %v847_v15  ;;  %v907_v19 = vmax.f32 %v845_v12, 0.0 }
 0x2a6   : > { %v910_v18 = vmax.f32 %v856_v14, 0.0 }
 0x2a7   : > { %v908_v20 = vmax.f32 %v848_v16, 0.0 }
 0x2a8   : > { %v924_v21 = vpack.c.bf16 %v910_v18, %v909_v17 }
 0x2a9   : > { %v923_v22 = vpack.c.bf16 %v908_v20, %v907_v19  ;;  %v1336_v23 = vpop.f32.mrb[20].mxu0 }
 0x2aa   : > { %v869_v24 = vadd.f32 %v1336_v23, %v1204_v8  ;;  %v860_v25 = vpop.f32.mrb[21].mxu0 }
 0x2ab   : > { %v861_v26 = vadd.f32 %v1204_v8, %v860_v25  ;;  %v1337_v27 = vpop.f32.mrb[22].mxu0  ;;  %1354 = vmatprep.mubr.msk.bf16.mxu1 %vm601_vm1, %v923_v22 }
 0x2ac   : > { %v872_v28 = vadd.f32 %v1337_v27, %v1204_v8  ;;  %v863_v29 = vpop.f32.mrb[23].mxu0  ;;  %1355 = vmatmul.mubr.msk.bf16.vlgmr.msra.gmra.mrb[16].mxu1 %vm601_vm1, %v924_v21  ;;  %v913_v31 = vmax.f32 %v869_v24, 0.0 }
 0x2ad   : > { %v864_v30 = vadd.f32 %v1204_v8, %v863_v29  ;;  %v911_v33 = vmax.f32 %v861_v26, 0.0 }
 0x2ae   : > { %v914_v32 = vmax.f32 %v872_v28, 0.0 }
 0x2af   : > { %v912_v34 = vmax.f32 %v864_v30, 0.0 }
 0x2b0   : > { %v926_v35 = vpack.c.bf16 %v914_v32, %v913_v31 }
 0x2b1   : > { %v925_v36 = vpack.c.bf16 %v912_v34, %v911_v33  ;;  %v1340_v37 = vpop.f32.mrb[24].mxu0 }
 0x2b2   : > { %v885_v38 = vadd.f32 %v1340_v37, %v1204_v8  ;;  %v876_v39 = vpop.f32.mrb[25].mxu0 }
 0x2b3   : > { %v877_v40 = vadd.f32 %v1204_v8, %v876_v39  ;;  %v1341_v41 = vpop.f32.mrb[26].mxu0  ;;  %1358 = vmatprep.mubr.msk.bf16.mxu1 %vm601_vm1, %v925_v36 }
 0x2b4   : > { %v888_v42 = vadd.f32 %v1341_v41, %v1204_v8  ;;  %v879_v43 = vpop.f32.mrb[27].mxu0  ;;  %1359 = vmatmul.mubr.msk.bf16.gmra.mrb[20].mxu1 %vm601_vm1, %v926_v35  ;;  %v917_v45 = vmax.f32 %v885_v38, 0.0 }
 0x2b5   : > { %v880_v44 = vadd.f32 %v1204_v8, %v879_v43  ;;  %v915_v47 = vmax.f32 %v877_v40, 0.0 }
 0x2b6   : > { %v918_v46 = vmax.f32 %v888_v42, 0.0 }
 0x2b7   : > { %v916_v48 = vmax.f32 %v880_v44, 0.0 }
 0x2b8   : > { %v928_v49 = vpack.c.bf16 %v918_v46, %v917_v45 }
 0x2b9   : > { %v927_v50 = vpack.c.bf16 %v916_v48, %v915_v47  ;;  %v1344_v51 = vpop.f32.mrb[28].mxu0 }
 0x2ba   : > { %v901_v52 = vadd.f32 %v1344_v51, %v1204_v8  ;;  %v892_v53 = vpop.f32.mrb[29].mxu0 }
 0x2bb   : > { %v893_v54 = vadd.f32 %v1204_v8, %v892_v53  ;;  %v1345_v55 = vpop.f32.mrb[30].mxu0  ;;  %1362 = vmatprep.mubr.msk.bf16.mxu1 %vm601_vm1, %v927_v50 }
 0x2bc   : > { %v904_v56 = vadd.f32 %v1345_v55, %v1204_v8  ;;  %v895_v57 = vpop.f32.mrb[31].mxu0  ;;  %1363 = vmatmul.mubr.msk.bf16.gmra.mrb[24].mxu1 %vm601_vm1, %v928_v49  ;;  %v921_v59 = vmax.f32 %v901_v52, 0.0 }
 0x2bd   : > { %v896_v58 = vadd.f32 %v1204_v8, %v895_v57  ;;  %v919_v61 = vmax.f32 %v893_v54, 0.0 }
 0x2be   : > { %v922_v60 = vmax.f32 %v904_v56, 0.0 }
 0x2bf   : > { %v920_v62 = vmax.f32 %v896_v58, 0.0 }
 0x2c0   : > { %v930_v63 = vpack.c.bf16 %v922_v60, %v921_v59 }
 0x2c1   : > { %v929_v0 = vpack.c.bf16 %v920_v62, %v919_v61 }
 0x2c3   : > { %1366 = vmatprep.mubr.msk.bf16.mxu1 %vm601_vm1, %v929_v0 }
 0x2c4   : > { %1367 = vmatmul.mubr.msk.bf16.gmra.mrb[28].mxu1 %vm601_vm1, %v930_v63 }
 0x37f   : > { %v1356_v2 = vpop.f32.mrb[16].mxu1 }
 0x380   : > { %v1037_v3 = vadd.f32 %v1356_v2, %v1217_v1  ;;  %v1028_v4 = vpop.f32.mrb[17].mxu1 }
 0x381   : > { %v1029_v5 = vadd.f32 %v1217_v1, %v1028_v4  ;;  %v1357_v6 = vpop.f32.mrb[18].mxu1 }
 0x382   : > { %1093 = vst [vmem:[%s1562_s17 + $0x10] sm:$0xff] %v1037_v3  ;;  %v1040_v7 = vadd.f32 %v1357_v6, %v1217_v1  ;;  %v1031_v8 = vpop.f32.mrb[19].mxu1 }
 0x383   : > { %1091 = vst [vmem:[%s1562_s17] sm:$0xff] %v1029_v5  ;;  %v1032_v9 = vadd.f32 %v1217_v1, %v1031_v8 }
 0x384   : > { %1094 = vst [vmem:[%s1562_s17 + $0x18] sm:$0xff] %v1040_v7 }
 0x385   : > { %1092 = vst [vmem:[%s1562_s17 + $0x8] sm:$0xff] %v1032_v9 }
 0x387   : > { %v1360_v10 = vpop.f32.mrb[20].mxu1 }
 0x388   : > { %v1053_v11 = vadd.f32 %v1360_v10, %v1217_v1  ;;  %v1044_v12 = vpop.f32.mrb[21].mxu1 }
 0x389   : > { %v1045_v13 = vadd.f32 %v1217_v1, %v1044_v12  ;;  %v1361_v14 = vpop.f32.mrb[22].mxu1 }
 0x38a   : > { %1097 = vst [vmem:[%s1562_s17 + $0x30] sm:$0xff] %v1053_v11  ;;  %v1056_v15 = vadd.f32 %v1361_v14, %v1217_v1  ;;  %v1047_v16 = vpop.f32.mrb[23].mxu1 }
 0x38b   : > { %1095 = vst [vmem:[%s1562_s17 + $0x20] sm:$0xff] %v1045_v13  ;;  %v1048_v17 = vadd.f32 %v1217_v1, %v1047_v16 }
 0x38c   : > { %1098 = vst [vmem:[%s1562_s17 + $0x38] sm:$0xff] %v1056_v15 }
 0x38d   : > { %1096 = vst [vmem:[%s1562_s17 + $0x28] sm:$0xff] %v1048_v17 }
 0x38f   : > { %v1364_v18 = vpop.f32.mrb[24].mxu1 }
 0x390   : > { %v1069_v19 = vadd.f32 %v1364_v18, %v1217_v1  ;;  %v1060_v20 = vpop.f32.mrb[25].mxu1 }
 0x391   : > { %v1061_v21 = vadd.f32 %v1217_v1, %v1060_v20  ;;  %v1365_v22 = vpop.f32.mrb[26].mxu1 }
 0x392   : > { %1101 = vst [vmem:[%s1562_s17 + $0x50] sm:$0xff] %v1069_v19  ;;  %v1072_v23 = vadd.f32 %v1365_v22, %v1217_v1  ;;  %v1063_v24 = vpop.f32.mrb[27].mxu1 }
 0x393   : > { %1099 = vst [vmem:[%s1562_s17 + $0x40] sm:$0xff] %v1061_v21  ;;  %v1064_v25 = vadd.f32 %v1217_v1, %v1063_v24 }
 0x394   : > { %1102 = vst [vmem:[%s1562_s17 + $0x58] sm:$0xff] %v1072_v23 }
 0x395   : > { %1100 = vst [vmem:[%s1562_s17 + $0x48] sm:$0xff] %v1064_v25 }
 0x397   : > { %v1368_v26 = vpop.f32.mrb[28].mxu1 }
 0x398   : > { %v1085_v27 = vadd.f32 %v1368_v26, %v1217_v1  ;;  %v1076_v28 = vpop.f32.mrb[29].mxu1 }
 0x399   : > { %v1077_v29 = vadd.f32 %v1217_v1, %v1076_v28  ;;  %v1369_v30 = vpop.f32.mrb[30].mxu1 }
 0x39a   : > { %1105 = vst [vmem:[%s1562_s17 + $0x70] sm:$0xff] %v1085_v27  ;;  %v1088_v31 = vadd.f32 %v1369_v30, %v1217_v1  ;;  %v1079_v32 = vpop.f32.mrb[31].mxu1 }
 0x39b   : > { %1103 = vst [vmem:[%s1562_s17 + $0x60] sm:$0xff] %v1077_v29  ;;  %v1080_v33 = vadd.f32 %v1217_v1, %v1079_v32 }
 0x39c   : > { %1106 = vst [vmem:[%s1562_s17 + $0x78] sm:$0xff] %v1088_v31 }
 0x39d   : > { %1104 = vst [vmem:[%s1562_s17 + $0x68] sm:$0xff] %v1080_v33 }
 0x39e PF: > { %s19_s30 = sadd.s32 1, %s1406_s30  }
 0x39f   : > { %p16_p4 = scmp.ge.s32.totalorder %s19_s30, 4  }
 0x3a1   :  { %18 = sbr.rel (!%p16_p4) target bundleno = 1 (0x1), region = 86 }

</bundles_post_ra>
